<compile_context>
chip_gen: v6e
topology: v6e:2x2x1
jax: 0.10.0
libtpu: 0.0.40
codegen_flags: <defaults>
</compile_context>

<pallas_src>
import math

import jax
import jax.numpy as jnp
from jax.experimental import pallas as pl
from jax.experimental.pallas import tpu as pltpu

LANE = 128


# ----------------------------- Pallas kernel -------------------------------

def _encoder_kernel(x_ref, w1_ref, b1_ref, w2_ref, b2_ref, o_ref):
    # x_ref:  (TILE_R, K)   VMEM (streamed)
    # w1_ref: (K, M)        VMEM (resident: index_map always (0,0))
    # b1_ref: (1, M)
    # w2_ref: (M, M)
    # b2_ref: (1, M)
    # o_ref:  (TILE_R, M)
    x = x_ref[...]
    if x.dtype != w1_ref.dtype:                 # cast at the MXU boundary only
        x = x.astype(w1_ref.dtype)
    h = jnp.dot(x, w1_ref[...], preferred_element_type=jnp.float32)
    h = h + b1_ref[...].astype(jnp.float32)     # VPU work stays f32
    h = jnp.maximum(h, 0.0)                     # ReLU
    h = h.astype(w2_ref.dtype)                  # bf16 at MXU input (no-op for f32)
    y = jnp.dot(h, w2_ref[...], preferred_element_type=jnp.float32)
    y = y + b2_ref[...].astype(jnp.float32)
    o_ref[...] = y.astype(o_ref.dtype)


# ------------------------------ helpers ------------------------------------

def _round_up(x, m):
    return (x + m - 1) // m * m


def _vmem_budget_bytes():
    """~75% of per-core VMEM: ~48 MiB on v7x (64 MiB), ~96 MiB on v5e/v6e."""
    try:
        cap = int(pltpu.get_tpu_info().vmem_capacity_bytes)
    except Exception:
        cap = 64 * 1024 * 1024                  # conservative fallback (v7x)
    return (cap * 3) // 4


def _run_mlp(x_rows, w1, b1, w2, b2, *, out_dtype, tile_max):
    """(R, K) -> (R_p, M) via Linear->ReLU->Linear; R_p >= R (rows padded)."""
    R, K = x_rows.shape
    M = w1.shape[1]

    x_bytes = jnp.dtype(x_rows.dtype).itemsize
    o_bytes = jnp.dtype(out_dtype).itemsize
    w_bytes = jnp.dtype(w1.dtype).itemsize

    # VMEM blocks round feature dims up to 128 lanes (footprint accounting).
    k_v = max(_round_up(K, LANE), LANE)
    m_v = max(_round_up(M, LANE), LANE)
    budget = _vmem_budget_bytes()

    def footprint(t):
        xb = 2 * t * k_v * x_bytes                              # streamed X (dbl buf)
        ob = 2 * t * m_v * o_bytes                              # streamed out (dbl buf)
        wb = 2 * (k_v * m_v + m_v * m_v + 2 * m_v) * w_bytes    # resident weights
        hb = 2 * t * m_v * 4                                    # f32 intermediates
        return xb + ob + wb + hb

    # Large MXU-filling tile, capped so the grid has >= 2 steps when there is
    # enough work (v7x has 2 TensorCores; v5e/v6e lose nothing).
    tile = max(8, _round_up(min(tile_max, R), 8))
    if R >= 16:
        tile = min(tile, _round_up(-(-R // 2), 8))
    while tile > 8 and footprint(tile) > budget:
        tile = max(8, _round_up(tile // 2, 8))

    # Re-balance the tile over the step count to minimise dead (padded) rows.
    steps = -(-R // tile)
    tile = _round_up(-(-R // steps), 8)
    R_p = steps * tile

    xp = x_rows if R_p == R else jnp.pad(x_rows, ((0, R_p - R), (0, 0)))
    b1r = b1.reshape(1, M)
    b2r = b2.reshape(1, M)

    flops = 2 * R_p * (K * M + M * M)
    bytes_accessed = (R_p * K * x_bytes + R_p * M * o_bytes
                      + (K * M + M * M + 2 * M) * w_bytes)
    vmem_limit = int(min(max(footprint(tile) * 3 // 2, 16 * 1024 * 1024), budget))

    out = pl.pallas_call(
        _encoder_kernel,
        out_shape=jax.ShapeDtypeStruct((R_p, M), out_dtype),
        grid=(steps,),
        in_specs=[
            pl.BlockSpec((tile, K), lambda i: (i, 0)),   # X rows (full feature dim)
            pl.BlockSpec((K, M), lambda i: (0, 0)),      # W1 (resident)
            pl.BlockSpec((1, M), lambda i: (0, 0)),      # b1
            pl.BlockSpec((M, M), lambda i: (0, 0)),      # W2
            pl.BlockSpec((1, M), lambda i: (0, 0)),      # b2
        ],
        out_specs=pl.BlockSpec((tile, M), lambda i: (i, 0)),
        compiler_params=pltpu.CompilerParams(
            dimension_semantics=("parallel",),
            vmem_limit_bytes=vmem_limit),
        cost_estimate=pl.CostEstimate(flops=flops, transcendentals=0,
                                      bytes_accessed=bytes_accessed),
    )(xp, w1, b1r, w2, b2r)
    return out, R_p


def _mlp_encoder(x_flat, w1, b1, w2, b2, *, tile_n=1024, out_dtype=None):
    """x_flat: (N, D_in) -> (N, D_out) via Linear->ReLU->Linear in one kernel."""
    N, D_in = x_flat.shape
    D_out = w1.shape[1]
    out_dtype = x_flat.dtype if out_dtype is None else out_dtype

    # Token-packing factor: smallest g with g*D_in and g*D_out multiples of 128.
    g = 1
    if max(D_in, D_out) < LANE:
        g1 = LANE // math.gcd(D_in, LANE)
        g2 = LANE // math.gcd(D_out, LANE)
        g_try = g1 * g2 // math.gcd(g1, g2)
        w_bytes = jnp.dtype(w1.dtype).itemsize
        packed_w_bytes = (g_try * g_try) * (D_in * D_out + D_out * D_out) * w_bytes
        if (g_try > 1 and g_try * max(D_in, D_out) <= 1024
                and packed_w_bytes <= (8 << 20)):
            g = g_try

    if g > 1:
        # Lane-dense path: g tokens per matrix row, block-diagonal weights.
        # Output rows are bit-identical to row-major (N, D_out) -> free reshape.
        N_pad = _round_up(N, g)
        xg = x_flat if N_pad == N else jnp.pad(x_flat, ((0, N_pad - N), (0, 0)))
        xg = xg.reshape(N_pad // g, g * D_in)             # free row-major reshape
        w1g = jnp.kron(jnp.eye(g, dtype=w1.dtype), w1)    # tiny, one-time
        w2g = jnp.kron(jnp.eye(g, dtype=w2.dtype), w2)
        b1g = jnp.tile(b1.reshape(-1), g)
        b2g = jnp.tile(b2.reshape(-1), g)
        out, _ = _run_mlp(xg, w1g, b1g, w2g, b2g,
                          out_dtype=out_dtype, tile_max=tile_n)
        out = out.reshape(-1, D_out)                       # free reshape to tokens
        return out[:N] if out.shape[0] != N else out

    # Direct path (features already lane-sized): no padding at all; narrow
    # outputs fall back to masked stores (acceptable — MXU/VPU have slack).
    out, R_p = _run_mlp(x_flat, w1, b1.reshape(-1), w2, b2.reshape(-1),
                        out_dtype=out_dtype, tile_max=tile_n)
    return out[:N] if R_p != N else out


# ------------------------------ module glue --------------------------------

def image_to_patch_tokens(img, patch_size):
    """einops: 'b c (t dt) (h dh) (w dw) -> b t h w (dt dh dw c)'."""
    B, C, T, H, W = img.shape
    pt, ph, pw = patch_size
    x = img.reshape(B, C, T // pt, pt, H // ph, ph, W // pw, pw)
    x = jnp.transpose(x, (0, 2, 4, 6, 3, 5, 7, 1))        # b t h w dt dh dw c
    return x.reshape(B, T // pt, H // ph, W // pw, pt * ph * pw * C)


def image_seq_tokenizer_forward(volume, params, patch_size, *, tile_n=1024,
                                activation_dtype=None):
    """
    volume: (B, C, T, H, W) — axis convention of ImageToPatchTokens' rearrange.
    returns: (B, (T/pt)*(H/ph)*(W/pw), out_channels)
    activation_dtype: optionally stream activations (and output) in bf16.
    """
    assert volume.ndim == 5, f"Images needs to have 5 dimensions {volume.shape}"
    w1, b1, w2, b2 = params
    # TODO(synk): fuse the patchify rearrange into the pallas_call (manual DMA
    #             gather) so this transpose never materialises in HBM.
    patches = image_to_patch_tokens(volume, patch_size)   # b t h w d
    B = patches.shape[0]
    D_in = patches.shape[-1]
    tokens = patches.reshape(B, -1, D_in)                  # b (t h w) d
    if activation_dtype is not None:
        tokens = tokens.astype(activation_dtype)           # folded into the copy
    n_tok = tokens.shape[1]
    x_flat = tokens.reshape(B * n_tok, D_in)
    out_dtype = volume.dtype if activation_dtype is None else activation_dtype
    out = _mlp_encoder(x_flat, w1, b1, w2, b2, tile_n=tile_n, out_dtype=out_dtype)
    return out.reshape(B, n_tok, -1)


def init_params(key, in_channels, out_channels, dtype=jnp.float32):
    """Xavier-uniform weights (gain=1), zero biases — matches the torch init."""
    k1, k2 = jax.random.split(key)

    def xavier(k, fan_in, fan_out):
        bound = math.sqrt(6.0 / (fan_in + fan_out))
        # stored as (in, out) so the kernel does X @ W directly
        return jax.random.uniform(k, (fan_in, fan_out), dtype,
                                  minval=-bound, maxval=bound)

    w1 = xavier(k1, in_channels, out_channels)
    b1 = jnp.zeros((out_channels,), dtype)
    w2 = xavier(k2, out_channels, out_channels)
    b2 = jnp.zeros((out_channels,), dtype)
    return (w1, b1, w2, b2)


# --------------------------------- main -------------------------------------

if __name__ == "__main__":
    key = jax.random.PRNGKey(0)

    # Small shapes consistent with the module:
    B, C, T, H, W = 2, 4, 2, 4, 4
    patch_size = (1, 2, 2)                                        # (pt, ph, pw)
    in_channels = patch_size[0] * patch_size[1] * patch_size[2] * C   # = 16
    out_channels = 32

    kx, kp = jax.random.split(key)
    volume = jax.random.normal(kx, (B, C, T, H, W), jnp.float32)
    params = init_params(kp, in_channels, out_channels)

    out = image_seq_tokenizer_forward(volume, params, patch_size)
    out = jax.block_until_ready(out)

    # Plain-JAX reference of the full forward (patchify + MLP).
    w1, b1, w2, b2 = params
    patches_ref = image_to_patch_tokens(volume, patch_size).reshape(B, -1, in_channels)
    ref = jnp.maximum(patches_ref @ w1 + b1, 0.0) @ w2 + b2
    n_tokens = (T // patch_size[0]) * (H // patch_size[1]) * (W // patch_size[2])
    assert out.shape == (B, n_tokens, out_channels)
    assert jnp.allclose(out, ref, atol=1e-5, rtol=1e-5)

    # bf16 weights + bf16 streamed activations (halves HBM bytes when mem-bound).
    params_bf16 = tuple(p.astype(jnp.bfloat16) for p in params)
    out_bf16 = image_seq_tokenizer_forward(volume, params_bf16, patch_size,
                                           activation_dtype=jnp.bfloat16)
    out_bf16 = jax.block_until_ready(out_bf16)
    assert out_bf16.shape == (B, n_tokens, out_channels)
    assert jnp.allclose(out_bf16.astype(jnp.float32), ref, atol=1e-1, rtol=1e-1)

    print("KERNEL_OK")
</pallas_src>

<mosaic_0001>
module attributes {stable_mosaic.version = 11 : i64} {
  func.func @_encoder_kernel(%arg0: i32, %arg1: memref<8x128xf32, #tpu.memory_space<vmem>>, %arg2: memref<128x256xf32, #tpu.memory_space<vmem>>, %arg3: memref<1x256xf32, #tpu.memory_space<vmem>>, %arg4: memref<256x256xf32, #tpu.memory_space<vmem>>, %arg5: memref<1x256xf32, #tpu.memory_space<vmem>>, %arg6: memref<8x256xf32, #tpu.memory_space<vmem>>) attributes {dimension_semantics = [#tpu.dimension_semantics<parallel>], iteration_bounds = array<i64: 1>, scalar_prefetch = 0 : i64, scratch_operands = 0 : i64, tpu.core_type = #tpu.core_type<tc>, window_params = [{transform_indices = @transform_0, window_bounds = array<i64: 8, 128>}, {pipeline_mode = #tpu.pipeline_mode<synchronous>, transform_indices = @transform_1, window_bounds = array<i64: 128, 256>}, {pipeline_mode = #tpu.pipeline_mode<synchronous>, transform_indices = @transform_2, window_bounds = array<i64: 1, 256>}, {pipeline_mode = #tpu.pipeline_mode<synchronous>, transform_indices = @transform_3, window_bounds = array<i64: 256, 256>}, {pipeline_mode = #tpu.pipeline_mode<synchronous>, transform_indices = @transform_4, window_bounds = array<i64: 1, 256>}, {transform_indices = @transform_5, window_bounds = array<i64: 8, 256>}]} {
    %c0 = arith.constant 0 : index
    %c0_0 = arith.constant 0 : index
    %0 = vector.load %arg1[%c0, %c0_0] : memref<8x128xf32, #tpu.memory_space<vmem>>, vector<8x128xf32>
    %c0_1 = arith.constant 0 : index
    %c0_2 = arith.constant 0 : index
    %1 = vector.load %arg2[%c0_1, %c0_2] : memref<128x256xf32, #tpu.memory_space<vmem>>, vector<128x256xf32>
    %cst = arith.constant dense<0.000000e+00> : vector<8x256xf32>
    %2 = tpu.matmul %0, %1, %cst {dimension_numbers = #tpu.dot_dimension_numbers<[1], [0], [0], [1], [0, 0, 1, 1], [], []>} : vector<8x128xf32>, vector<128x256xf32>, vector<8x256xf32> -> vector<8x256xf32>
    %c0_3 = arith.constant 0 : index
    %c0_4 = arith.constant 0 : index
    %3 = vector.load %arg3[%c0_3, %c0_4] : memref<1x256xf32, #tpu.memory_space<vmem>>, vector<1x256xf32>
    %4 = vector.broadcast %3 : vector<1x256xf32> to vector<8x256xf32>
    %5 = arith.addf %2, %4 : vector<8x256xf32>
    %cst_5 = arith.constant 0.000000e+00 : f32
    %6 = vector.broadcast %cst_5 : f32 to vector<8x256xf32>
    %7 = arith.maximumf %5, %6 : vector<8x256xf32>
    %c0_6 = arith.constant 0 : index
    %c0_7 = arith.constant 0 : index
    %8 = vector.load %arg4[%c0_6, %c0_7] : memref<256x256xf32, #tpu.memory_space<vmem>>, vector<256x256xf32>
    %cst_8 = arith.constant dense<0.000000e+00> : vector<8x256xf32>
    %9 = tpu.matmul %7, %8, %cst_8 {dimension_numbers = #tpu.dot_dimension_numbers<[1], [0], [0], [1], [0, 0, 1, 1], [], []>} : vector<8x256xf32>, vector<256x256xf32>, vector<8x256xf32> -> vector<8x256xf32>
    %c0_9 = arith.constant 0 : index
    %c0_10 = arith.constant 0 : index
    %10 = vector.load %arg5[%c0_9, %c0_10] : memref<1x256xf32, #tpu.memory_space<vmem>>, vector<1x256xf32>
    %11 = vector.broadcast %10 : vector<1x256xf32> to vector<8x256xf32>
    %12 = arith.addf %9, %11 : vector<8x256xf32>
    %c0_11 = arith.constant 0 : index
    %c0_12 = arith.constant 0 : index
    %13 = vector.load %arg6[%c0_11, %c0_12] : memref<8x256xf32, #tpu.memory_space<vmem>>, vector<8x256xf32>
    tpu.vector_store %arg6[%c0_11, %c0_12], %12 {strides = array<i32>} : memref<8x256xf32, #tpu.memory_space<vmem>>, vector<8x256xf32>,
    return
  }
  func.func @transform_0(%arg0: i32) -> (i32, i32) {
    %c0_i32 = arith.constant 0 : i32
    %c0_i32_0 = arith.constant 0 : i32
    return %arg0, %c0_i32 : i32, i32
  }
  func.func @transform_1(%arg0: i32) -> (i32, i32) {
    %c0_i32 = arith.constant 0 : i32
    %c0_i32_0 = arith.constant 0 : i32
    %c0_i32_1 = arith.constant 0 : i32
    return %c0_i32, %c0_i32_0 : i32, i32
  }
  func.func @transform_2(%arg0: i32) -> (i32, i32) {
    %c0_i32 = arith.constant 0 : i32
    %c0_i32_0 = arith.constant 0 : i32
    %c0_i32_1 = arith.constant 0 : i32
    return %c0_i32, %c0_i32_0 : i32, i32
  }
  func.func @transform_3(%arg0: i32) -> (i32, i32) {
    %c0_i32 = arith.constant 0 : i32
    %c0_i32_0 = arith.constant 0 : i32
    %c0_i32_1 = arith.constant 0 : i32
    return %c0_i32, %c0_i32_0 : i32, i32
  }
  func.func @transform_4(%arg0: i32) -> (i32, i32) {
    %c0_i32 = arith.constant 0 : i32
    %c0_i32_0 = arith.constant 0 : i32
    %c0_i32_1 = arith.constant 0 : i32
    return %c0_i32, %c0_i32_0 : i32, i32
  }
  func.func @transform_5(%arg0: i32) -> (i32, i32) {
    %c0_i32 = arith.constant 0 : i32
    %c0_i32_0 = arith.constant 0 : i32
    return %arg0, %c0_i32 : i32, i32
  }
}

</mosaic_0001>

<bundles_post_ra>
// kernel: tpu_custom_call.1
= control target key start
LH: loop header
LB: loop body
LE: loop exit
PB: predicated region body
PF: predicated region fallthrough
CT: control target
= control target key end

     0   :  { %10 = vsyncpa [#allocation3], 0  ;;  %s491_s0 = inlined_call_operand.hbm [shape: f32[8,128], index: 0, kind: input, shape index: {}]   ;;  %s492_s1 = inlined_call_operand.hbm [shape: f32[128,256], index: 1, kind: input, shape index: {}]   ;;  %s493_s2 = inlined_call_operand.vmem [shape: f32[1,256], index: 2, kind: input, shape index: {}]   ;;  %s494_s3 = inlined_call_operand.hbm [shape: f32[256,256], index: 3, kind: input, shape index: {}]   ;;  %s495_s4 = inlined_call_operand.vmem [shape: f32[1,256], index: 4, kind: input, shape index: {}]   ;;  %s496_s5 = inlined_call_operand.hbm [shape: f32[8,256], index: 5, kind: output, shape index: {}]  }
   0x1   :  { %11 = vsyncpa [#allocation6], 0 }
   0x2   :  { %12 = vsyncpa [#allocation4], 0  ;;  %s436_s18 = smov [#allocation5]  }
   0x3   :  { %s28_s19 = sshll.u32 %s436_s18, 4  ;;  %s29_s19 = int_to_ptr.vmem [resolvable:$true] %s28_s19 }
   0x4   :  { %s358_s20 = scalar_lea.vmem %s29_s19, 4096  ;;  %p363_p1 = scmp.lt.s32.totalorder %s29_s19, %s29_s19 }
   0x5   :  { %p359_p0 = scmp.ne.s32.totalorder %s29_s19, %s358_s20  ;;  %p364_p2 = scmp.lt.s32.totalorder %s358_s20, %s358_s20 }
   0x7   :  { %p365_p3 = por %p364_p2, %p363_p1 }
   0x9   :  { %p366_p4 = pnand %p365_p3, %p359_p0 }
   0xb   :  { %369 = shalt.err (!%p366_p4)
}
   0xc   :  { %s437_s21 = smov 256   ;;  %s438_s22 = smov 16  }
   0xd   :  { %34 = dma.hbm_to_vmem [thread:$0]  %s492_s1, 4096, %s29_s19, [#allocation6], %s437_s21, %s437_s21, %s438_s22  }
   0xe   :  { %s439_s25 = smov [#allocation2]   ;;  %s440_s27 = smov [#allocation7]  }
   0xf   :  { %s19_s26 = sshll.u32 %s439_s25, 4  ;;  %s42_s28 = sshll.u32 %s440_s27, 4  ;;  %s20_s26 = int_to_ptr.vmem [resolvable:$true] %s19_s26  ;;  %s43_s28 = int_to_ptr.vmem [resolvable:$true] %s42_s28 }
  0x10   :  { %s378_s29 = scalar_lea.vmem %s20_s26, 128  ;;  %p383_p6 = scmp.lt.s32.totalorder %s20_s26, %s20_s26 }
  0x11   :  { %p379_p5 = scmp.ne.s32.totalorder %s20_s26, %s378_s29  ;;  %p384_p7 = scmp.lt.s32.totalorder %s378_s29, %s378_s29 }
  0x13   :  { %p385_p8 = por %p384_p7, %p383_p6 }
  0x15   :  { %p386_p9 = pnand %p385_p8, %p379_p5 }
  0x17   :  { %389 = shalt.err (!%p386_p9)
}
  0x18   :  { %22 = dma.hbm_to_vmem [thread:$0]  %s491_s0, 128, %s20_s26, [#allocation3]  }
  0x19   :  { %s398_s7 = scalar_lea.vmem %s43_s28, 8192  ;;  %p403_p11 = scmp.lt.s32.totalorder %s43_s28, %s43_s28 }
  0x1a   :  { %p399_p10 = scmp.ne.s32.totalorder %s43_s28, %s398_s7  ;;  %p404_p12 = scmp.lt.s32.totalorder %s398_s7, %s398_s7 }
  0x1c   :  { %p405_p13 = por %p404_p12, %p403_p11 }
  0x1e   :  { %p406_p0 = pnand %p405_p13, %p399_p10 }
  0x20   :  { %409 = shalt.err (!%p406_p0)
}
  0x21   :  { %48 = dma.hbm_to_vmem [thread:$0]  %s494_s3, 8192, %s43_s28, [#allocation6], %s437_s21, %s437_s21, %s438_s22  }
  0x22   :  { %430 = dma.done.wait [#allocation3], 128  }
  0x23   :  { %431 = vsyncadd [#allocation3], 4294967168 }
  0x24   :  { %432 = dma.done.wait [#allocation6], 12288  }
  0x25   :  { %433 = vsyncadd [#allocation6], 4294955008  ;;  %v441_v0 = vmov 0.0   ;;  %v92_v1 = vld [vmem:[#allocation5 + $0xf8] sm:$0xff]  ;;  %v91_v2 = vld [vmem:[#allocation5 + $0xf0] sm:$0xff]  ;;  %s442_s11 = smov [#allocation8]  }
  0x26   :  { %169 = vmatprep.mubr.f32.mxu0 %v441_v0  ;;  %v90_v3 = vld [vmem:[#allocation5 + $0xe8] sm:$0xff]  ;;  %105 = vmatprep.subr.mxu0 %v92_v1  ;;  %v89_v4 = vld [vmem:[#allocation5 + $0xe0] sm:$0xff]  ;;  %v88_v5 = vld [vmem:[#allocation5 + $0xd8] sm:$0xff] }
  0x27   :  { %106 = vmatpush1.msra.mxu0 %v91_v2  ;;  %v87_v6 = vld [vmem:[#allocation5 + $0xd0] sm:$0xff]  ;;  %v86_v7 = vld [vmem:[#allocation5 + $0xc8] sm:$0xff]  ;;  %v85_v8 = vld [vmem:[#allocation5 + $0xc0] sm:$0xff] }
  0x28   :  { %107 = vmatprep.subr.mxu0 %v90_v3  ;;  %v84_v9 = vld [vmem:[#allocation5 + $0xb8] sm:$0xff]  ;;  %v83_v10 = vld [vmem:[#allocation5 + $0xb0] sm:$0xff]  ;;  %v82_v11 = vld [vmem:[#allocation5 + $0xa8] sm:$0xff] }
  0x29   :  { %108 = vmatpush1.msra.mxu0 %v89_v4  ;;  %v81_v12 = vld [vmem:[#allocation5 + $0xa0] sm:$0xff]  ;;  %v80_v13 = vld [vmem:[#allocation5 + $0x98] sm:$0xff]  ;;  %v79_v14 = vld [vmem:[#allocation5 + $0x90] sm:$0xff] }
  0x2a   :  { %109 = vmatprep.subr.mxu0 %v88_v5  ;;  %v209_v15 = vld [vmem:[#allocation7 + $0xf8] sm:$0xff]  ;;  %v208_v16 = vld [vmem:[#allocation7 + $0xf0] sm:$0xff]  ;;  %v207_v17 = vld [vmem:[#allocation7 + $0xe8] sm:$0xff] }
  0x2b   :  { %110 = vmatpush1.msra.mxu0 %v87_v6  ;;  %v78_v18 = vld [vmem:[#allocation5 + $0x88] sm:$0xff]  ;;  %254 = vmatprep.subr.mxu1 %v209_v15  ;;  %v206_v19 = vld [vmem:[#allocation7 + $0xe0] sm:$0xff]  ;;  %v205_v21 = vld [vmem:[#allocation7 + $0xd8] sm:$0xff] }
  0x2c   :  { %111 = vmatprep.subr.mxu0 %v86_v7  ;;  %v77_v20 = vld [vmem:[#allocation5 + $0x80] sm:$0xff]  ;;  %255 = vmatpush1.msra.mxu1 %v208_v16  ;;  %v76_v22 = vld [vmem:[#allocation5 + $0x78] sm:$0xff]  ;;  %v204_v23 = vld [vmem:[#allocation7 + $0xd0] sm:$0xff] }
  0x2d   :  { %112 = vmatpush1.msra.mxu0 %v85_v8  ;;  %256 = vmatprep.subr.mxu1 %v207_v17  ;;  %v75_v24 = vld [vmem:[#allocation5 + $0x70] sm:$0xff]  ;;  %v203_v25 = vld [vmem:[#allocation7 + $0xc8] sm:$0xff]  ;;  %v202_v27 = vld [vmem:[#allocation7 + $0xc0] sm:$0xff] }
  0x2e   :  { %113 = vmatprep.subr.mxu0 %v84_v9  ;;  %257 = vmatpush1.msra.mxu1 %v206_v19  ;;  %v74_v26 = vld [vmem:[#allocation5 + $0x68] sm:$0xff]  ;;  %v73_v28 = vld [vmem:[#allocation5 + $0x60] sm:$0xff]  ;;  %v201_v29 = vld [vmem:[#allocation7 + $0xb8] sm:$0xff] }
  0x2f   :  { %114 = vmatpush1.msra.mxu0 %v83_v10  ;;  %258 = vmatprep.subr.mxu1 %v205_v21  ;;  %v72_v30 = vld [vmem:[#allocation5 + $0x58] sm:$0xff]  ;;  %v200_v31 = vld [vmem:[#allocation7 + $0xb0] sm:$0xff]  ;;  %v199_v33 = vld [vmem:[#allocation7 + $0xa8] sm:$0xff] }
  0x30   :  { %115 = vmatprep.subr.mxu0 %v82_v11  ;;  %259 = vmatpush1.msra.mxu1 %v204_v23  ;;  %v71_v32 = vld [vmem:[#allocation5 + $0x50] sm:$0xff]  ;;  %v70_v34 = vld [vmem:[#allocation5 + $0x48] sm:$0xff]  ;;  %v198_v35 = vld [vmem:[#allocation7 + $0xa0] sm:$0xff] }
  0x31   :  { %116 = vmatpush1.msra.mxu0 %v81_v12  ;;  %260 = vmatprep.subr.mxu1 %v203_v25  ;;  %v69_v36 = vld [vmem:[#allocation5 + $0x40] sm:$0xff]  ;;  %v197_v37 = vld [vmem:[#allocation7 + $0x98] sm:$0xff]  ;;  %v196_v39 = vld [vmem:[#allocation7 + $0x90] sm:$0xff] }
  0x32   :  { %117 = vmatprep.subr.mxu0 %v80_v13  ;;  %261 = vmatpush1.msra.mxu1 %v202_v27  ;;  %v68_v38 = vld [vmem:[#allocation5 + $0x38] sm:$0xff]  ;;  %v67_v40 = vld [vmem:[#allocation5 + $0x30] sm:$0xff]  ;;  %v195_v41 = vld [vmem:[#allocation7 + $0x88] sm:$0xff] }
  0x33   :  { %118 = vmatpush1.msra.mxu0 %v79_v14  ;;  %262 = vmatprep.subr.mxu1 %v201_v29  ;;  %v66_v42 = vld [vmem:[#allocation5 + $0x28] sm:$0xff]  ;;  %v194_v43 = vld [vmem:[#allocation7 + $0x80] sm:$0xff]  ;;  %v193_v45 = vld [vmem:[#allocation7 + $0x78] sm:$0xff] }
  0x34   :  { %119 = vmatprep.subr.mxu0 %v78_v18  ;;  %263 = vmatpush1.msra.mxu1 %v200_v31  ;;  %v65_v44 = vld [vmem:[#allocation5 + $0x20] sm:$0xff]  ;;  %v64_v46 = vld [vmem:[#allocation5 + $0x18] sm:$0xff]  ;;  %v192_v47 = vld [vmem:[#allocation7 + $0x70] sm:$0xff] }
  0x35   :  { %120 = vmatpush1.msra.mxu0 %v77_v20  ;;  %264 = vmatprep.subr.mxu1 %v199_v33  ;;  %v63_v48 = vld [vmem:[#allocation5 + $0x10] sm:$0xff]  ;;  %v191_v49 = vld [vmem:[#allocation7 + $0x68] sm:$0xff]  ;;  %v190_v51 = vld [vmem:[#allocation7 + $0x60] sm:$0xff] }
  0x36   :  { %121 = vmatprep.subr.mxu0 %v76_v22  ;;  %265 = vmatpush1.msra.mxu1 %v198_v35  ;;  %v62_v50 = vld [vmem:[#allocation5 + $0x8] sm:$0xff]  ;;  %v61_v52 = vld [vmem:[#allocation5] sm:$0xff]  ;;  %v189_v53 = vld [vmem:[#allocation7 + $0x58] sm:$0xff] }
  0x37   :  { %122 = vmatpush1.msra.mxu0 %v75_v24  ;;  %266 = vmatprep.subr.mxu1 %v197_v37  ;;  %v60_v54 = vld [vmem:[#allocation2] sm:$0xff]  ;;  %v188_v55 = vld [vmem:[#allocation7 + $0x50] sm:$0xff]  ;;  %v187_v56 = vld [vmem:[#allocation7 + $0x48] sm:$0xff] }
  0x38   :  { %123 = vmatprep.subr.mxu0 %v74_v26  ;;  %267 = vmatpush1.msra.mxu1 %v196_v39  ;;  %v186_v57 = vld [vmem:[#allocation7 + $0x40] sm:$0xff]  ;;  %v185_v58 = vld [vmem:[#allocation7 + $0x38] sm:$0xff]  ;;  %v184_v59 = vld [vmem:[#allocation7 + $0x30] sm:$0xff] }
  0x39   :  { %124 = vmatpush1.msra.mxu0 %v73_v28  ;;  %268 = vmatprep.subr.mxu1 %v195_v41  ;;  %v183_v60 = vld [vmem:[#allocation7 + $0x28] sm:$0xff]  ;;  %v182_v61 = vld [vmem:[#allocation7 + $0x20] sm:$0xff]  ;;  %v181_v62 = vld [vmem:[#allocation7 + $0x18] sm:$0xff] }
  0x3a   :  { %125 = vmatprep.subr.mxu0 %v72_v30  ;;  %269 = vmatpush1.msra.mxu1 %v194_v43  ;;  %v180_v63 = vld [vmem:[#allocation7 + $0x10] sm:$0xff]  ;;  %v179_v0 = vld [vmem:[#allocation7 + $0x8] sm:$0xff]  ;;  %v178_v1 = vld [vmem:[#allocation7] sm:$0xff] }
  0x3b   :  { %126 = vmatpush1.msra.mxu0 %v71_v32  ;;  %270 = vmatprep.subr.mxu1 %v193_v45  ;;  %v241_v2 = vld [vmem:[#allocation7 + $0x1f8] sm:$0xff]  ;;  %v240_v3 = vld [vmem:[#allocation7 + $0x1f0] sm:$0xff]  ;;  %v239_v4 = vld [vmem:[#allocation7 + $0x1e8] sm:$0xff] }
  0x3c   :  { %127 = vmatprep.subr.mxu0 %v70_v34  ;;  %271 = vmatpush1.msra.mxu1 %v192_v47  ;;  %v238_v5 = vld [vmem:[#allocation7 + $0x1e0] sm:$0xff]  ;;  %v237_v6 = vld [vmem:[#allocation7 + $0x1d8] sm:$0xff]  ;;  %v236_v7 = vld [vmem:[#allocation7 + $0x1d0] sm:$0xff]  ;;  %v95_v34 = vlaneseq }
  0x3d   :  { %128 = vmatpush1.msra.mxu0 %v69_v36  ;;  %272 = vmatprep.subr.mxu1 %v191_v49  ;;  %v235_v8 = vld [vmem:[#allocation7 + $0x1c8] sm:$0xff]  ;;  %v234_v9 = vld [vmem:[#allocation7 + $0x1c0] sm:$0xff]  ;;  %v233_v10 = vld [vmem:[#allocation7 + $0x1b8] sm:$0xff] }
  0x3e   :  { %129 = vmatprep.subr.mxu0 %v68_v38  ;;  %273 = vmatpush1.msra.mxu1 %v190_v51  ;;  %v232_v11 = vld [vmem:[#allocation7 + $0x1b0] sm:$0xff]  ;;  %v231_v12 = vld [vmem:[#allocation7 + $0x1a8] sm:$0xff]  ;;  %v230_v13 = vld [vmem:[#allocation7 + $0x1a0] sm:$0xff]  ;;  %v96_v35 = vshrl.u32 %v95_v34, 7 }
  0x3f   :  { %130 = vmatpush1.msra.mxu0 %v67_v40  ;;  %274 = vmatprep.subr.mxu1 %v189_v53  ;;  %v229_v14 = vld [vmem:[#allocation7 + $0x198] sm:$0xff]  ;;  %v228_v15 = vld [vmem:[#allocation7 + $0x190] sm:$0xff]  ;;  %v227_v16 = vld [vmem:[#allocation7 + $0x188] sm:$0xff] }
  0x40   :  { %131 = vmatprep.subr.mxu0 %v66_v42  ;;  %275 = vmatpush1.msra.mxu1 %v188_v55  ;;  %v226_v17 = vld [vmem:[#allocation7 + $0x180] sm:$0xff]  ;;  %v225_v18 = vld [vmem:[#allocation7 + $0x178] sm:$0xff]  ;;  %v224_v19 = vld [vmem:[#allocation7 + $0x170] sm:$0xff]  ;;  %v97_v36 = vsub.s32 0, %v96_v35  ;;  %v101_v38 = vsub.s32 1, %v96_v35 }
  0x41   :  { %132 = vmatpush1.msra.mxu0 %v65_v44  ;;  %276 = vmatprep.subr.mxu1 %v187_v56  ;;  %v223_v20 = vld [vmem:[#allocation7 + $0x168] sm:$0xff]  ;;  %v222_v21 = vld [vmem:[#allocation7 + $0x160] sm:$0xff]  ;;  %v221_v22 = vld [vmem:[#allocation7 + $0x158] sm:$0xff] }
  0x42   :  { %133 = vmatprep.subr.mxu0 %v64_v46  ;;  %277 = vmatpush1.msra.mxu1 %v186_v57  ;;  %v220_v23 = vld [vmem:[#allocation7 + $0x150] sm:$0xff]  ;;  %v219_v24 = vld [vmem:[#allocation7 + $0x148] sm:$0xff]  ;;  %v218_v25 = vld [vmem:[#allocation7 + $0x140] sm:$0xff] }
  0x43   :  { %134 = vmatpush1.msra.mxu0 %v63_v48  ;;  %278 = vmatprep.subr.mxu1 %v185_v58  ;;  %v217_v26 = vld [vmem:[#allocation7 + $0x138] sm:$0xff]  ;;  %v216_v27 = vld [vmem:[#allocation7 + $0x130] sm:$0xff]  ;;  %v215_v28 = vld [vmem:[#allocation7 + $0x128] sm:$0xff] }
  0x44   :  { %135 = vmatprep.subr.mxu0 %v62_v50  ;;  %279 = vmatpush1.msra.mxu1 %v184_v59  ;;  %v214_v29 = vld [vmem:[#allocation7 + $0x120] sm:$0xff]  ;;  %v213_v30 = vld [vmem:[#allocation7 + $0x118] sm:$0xff]  ;;  %v212_v31 = vld [vmem:[#allocation7 + $0x110] sm:$0xff] }
  0x45   :  { %136 = vmatpush1.msra.mxu0 %v61_v52  ;;  %280 = vmatprep.subr.mxu1 %v183_v60  ;;  %v211_v32 = vld [vmem:[#allocation7 + $0x108] sm:$0xff]  ;;  %v210_v33 = vld [vmem:[#allocation7 + $0x100] sm:$0xff]  ;;  %v93_v37 = vld [vmem:[%s493_s2] sm:$0x3]  ;;  %s333_s2 = sshll.u32 %s442_s11, 4  ;;  %s334_s2 = int_to_ptr.vmem [resolvable:$true] %s333_s2 }
  0x46   :  { %170 = vmatmul.mubr.f32.vlgmr.msra.gmra.mxu0 %v60_v54  ;;  %281 = vmatpush1.msra.mxu1 %v182_v61  ;;  %v98_v39 = vrot.slane %v93_v37, %v97_v36  ;;  %v102_v40 = vrot.slane %v93_v37, %v101_v38  ;;  %v242_v47 = vld [vmem:[%s495_s4] sm:$0x3]  ;;  %s410_s12 = scalar_lea.vmem %s334_s2, 256  ;;  %p415_p2 = scmp.lt.s32.totalorder %s334_s2, %s334_s2 }
  0x47   :  { %282 = vmatprep.subr.mxu1 %v181_v62  ;;  %v247_v48 = vrot.slane %v242_v47, %v97_v36  ;;  %v251_v49 = vrot.slane %v242_v47, %v101_v38  ;;  %p411_p1 = scmp.ne.s32.totalorder %s334_s2, %s410_s12  ;;  %p416_p3 = scmp.lt.s32.totalorder %s410_s12, %s410_s12 }
  0x48   :  { %283 = vmatpush1.msra.mxu1 %v180_v63 }
  0x49   :  { %284 = vmatprep.subr.mxu1 %v179_v0  ;;  %p417_p4 = por %p416_p3, %p415_p2 }
  0x4a   :  { %285 = vmatpush1.msra.mxu1 %v178_v1 }
  0x4b   :  { %286 = vmatprep.subr.mxu1 %v241_v2  ;;  %p418_p5 = pnand %p417_p4, %p411_p1 }
  0x4c   :  { %287 = vmatpush2.msra.mxu1 %v240_v3 }
  0x4d   :  { %288 = vmatprep.subr.mxu1 %v239_v4 }
  0x4e   :  { %289 = vmatpush2.msra.mxu1 %v238_v5 }
  0x4f   :  { %290 = vmatprep.subr.mxu1 %v237_v6 }
  0x50   :  { %291 = vmatpush2.msra.mxu1 %v236_v7 }
  0x51   :  { %292 = vmatprep.subr.mxu1 %v235_v8 }
  0x52   :  { %293 = vmatpush2.msra.mxu1 %v234_v9 }
  0x53   :  { %294 = vmatprep.subr.mxu1 %v233_v10 }
  0x54   :  { %295 = vmatpush2.msra.mxu1 %v232_v11 }
  0x55   :  { %296 = vmatprep.subr.mxu1 %v231_v12 }
  0x56   :  { %297 = vmatpush2.msra.mxu1 %v230_v13 }
  0x57   :  { %298 = vmatprep.subr.mxu1 %v229_v14 }
  0x58   :  { %299 = vmatpush2.msra.mxu1 %v228_v15 }
  0x59   :  { %300 = vmatprep.subr.mxu1 %v227_v16 }
  0x5a   :  { %301 = vmatpush2.msra.mxu1 %v226_v17 }
  0x5b   :  { %302 = vmatprep.subr.mxu1 %v225_v18 }
  0x5c   :  { %303 = vmatpush2.msra.mxu1 %v224_v19 }
  0x5d   :  { %304 = vmatprep.subr.mxu1 %v223_v20 }
  0x5e   :  { %305 = vmatpush2.msra.mxu1 %v222_v21 }
  0x5f   :  { %306 = vmatprep.subr.mxu1 %v221_v22 }
  0x60   :  { %307 = vmatpush2.msra.mxu1 %v220_v23 }
  0x61   :  { %308 = vmatprep.subr.mxu1 %v219_v24 }
  0x62   :  { %309 = vmatpush2.msra.mxu1 %v218_v25 }
  0x63   :  { %310 = vmatprep.subr.mxu1 %v217_v26 }
  0x64   :  { %311 = vmatpush2.msra.mxu1 %v216_v27 }
  0x65   :  { %312 = vmatprep.subr.mxu1 %v215_v28 }
  0x66   :  { %313 = vmatpush2.msra.mxu1 %v214_v29 }
  0x67   :  { %314 = vmatprep.subr.mxu1 %v213_v30 }
  0x68   :  { %315 = vmatpush2.msra.mxu1 %v212_v31 }
  0x69   :  { %316 = vmatprep.subr.mxu1 %v211_v32 }
  0x6a   :  { %317 = vmatpush2.msra.mxu1 %v210_v33 }
 0x106   :  { %v171_v41 = vpop.f32.mrf.mxu0 }
 0x107   :  { %v172_v42 = vadd.f32 %v171_v41, %v98_v39 }
 0x108   :  { %v173_v43 = vpop.f32.mrf.mxu0 }
 0x109   :  { %v174_v44 = vadd.f32 %v173_v43, %v102_v40  ;;  %v176_v46 = vmax.f32 %v172_v42, 0.0 }
 0x10b   :  { %v177_v45 = vmax.f32 %v174_v44, 0.0 }
 0x10d   :  { %318 = vmatprep.mubr.f32.mxu1 %v177_v45 }
 0x10e   :  { %319 = vmatmul.mubr.f32.vlgmr.msra.gmra.mxu1 %v176_v46 }
 0x1ce   :  { %v320_v50 = vpop.f32.mrf.mxu1 }
 0x1cf   :  { %v321_v51 = vadd.f32 %v320_v50, %v247_v48 }
 0x1d0   :  { %v322_v52 = vpop.f32.mrf.mxu1 }
 0x1d1   :  { %325 = vst [vmem:[#allocation8] sm:$0xff] %v321_v51  ;;  %v323_v53 = vadd.f32 %v322_v52, %v251_v49 }
 0x1d3   :  { %326 = vst [vmem:[#allocation8 + $0x8] sm:$0xff] %v323_v53 }
 0x1d4   :  { %421 = shalt.err (!%p418_p5)
}
 0x1d5   :  { %336 = dma.vmem_to_hbm [thread:$0]  %s334_s2, 256, %s496_s5, [#allocation4]  }
 0x1d6   :  { %434 = dma.done.wait [#allocation4], 256  }
 0x1d7   :  { %435 = vsyncadd [#allocation4], 4294967040 }
 0x1d8   :  { %340 = vsyncpa [#allocation3], 1 }
 0x1d9   :  { %341 = vsyncpa [#allocation6], 1 }
 0x1da   :  { %342 = vsyncpa [#allocation4], 1 }

</bundles_post_ra>
